<compile_context>
chip_gen: v6e
topology: v6e:2x2x1
jax: 0.10.0
libtpu: 0.0.40
codegen_flags: <defaults>
</compile_context>

<pallas_src>
import functools
import math

import jax
import jax.numpy as jnp
from jax import lax
from jax.experimental import pallas as pl
from jax.experimental.pallas import tpu as pltpu


def _pma_decoder_kernel(seed_ref, wq_ref, wk_ref, wv_ref, wo_ref, bo_ref,
                        x_ref, o_ref,
                        wkq_sc, m_sc, l_sc, r_sc,
                        *, n_valid, tile_n, c, num_heads, hpad):
    i = pl.program_id(0)
    dh = c // num_heads

    @pl.when(i == 0)
    def _init():
        # head-membership mask: hmask[d, h] = 1 iff channel d belongs to head h
        d_idx = lax.broadcasted_iota(jnp.int32, (c, hpad), 0)
        h_idx = lax.broadcasted_iota(jnp.int32, (c, hpad), 1)
        lo = h_idx * dh
        hmask = jnp.where(
            (d_idx >= lo) & (d_idx < lo + dh) & (h_idx < num_heads),
            1.0, 0.0).astype(jnp.bfloat16)                        # (C, Hpad)
        # q = seed @ Wq  (the 1/sqrt(dh) scale is pre-folded into Wq on host)
        q = jnp.dot(seed_ref[...], wq_ref[...],
                    preferred_element_type=jnp.float32)           # (1, C)
        # fold q into Wk once: wkq[e, h] = sum_d Wk[e, d] * q[d] * hmask[d, h]
        wkq = jnp.dot((wk_ref[...].astype(jnp.float32) * q).astype(jnp.bfloat16),
                      hmask, preferred_element_type=jnp.float32)  # (C, Hpad)
        wkq_sc[...] = wkq.astype(jnp.bfloat16)
        m_sc[...] = jnp.full(m_sc.shape, -jnp.inf, jnp.float32)
        l_sc[...] = jnp.zeros(l_sc.shape, jnp.float32)
        r_sc[...] = jnp.zeros(r_sc.shape, jnp.float32)

    x_t = x_ref[...]                                              # (tile_n, C) bf16

    # per-head scores in a single bf16 MXU pass
    s = jnp.dot(x_t, wkq_sc[...],
                preferred_element_type=jnp.float32)               # (tile_n, Hpad)

    # mask rows beyond the true set size (rows are zero-padded to a full tile)
    row = lax.broadcasted_iota(jnp.int32, (tile_n, 1), 0) + i * tile_n
    s = jnp.where(row < n_valid, s, -jnp.inf)

    # online softmax over the set dimension, per head
    m_prev = m_sc[...]
    m_new = jnp.maximum(m_prev, jnp.max(s, axis=0, keepdims=True))   # (1, Hpad)
    alpha = jnp.exp(m_prev - m_new)                                  # (1, Hpad)
    p = jnp.exp(s - m_new)                                           # (tile_n, Hpad)
    l_sc[...] = alpha * l_sc[...] + jnp.sum(p, axis=0, keepdims=True)

    # R[e, h] accumulates sum_n x[n, e] * p[n, h]  (V projection deferred)
    r_new = lax.dot_general(x_t, p.astype(jnp.bfloat16),
                            (((0,), (0,)), ((), ())),
                            preferred_element_type=jnp.float32)      # (C, Hpad)
    r_sc[...] = alpha * r_sc[...] + r_new
    m_sc[...] = m_new

    @pl.when(i == pl.num_programs(0) - 1)
    def _finalize():
        inv_l = pl.reciprocal(l_sc[...], approx=True)                # (1, Hpad)
        rn = r_sc[...] * inv_l                                       # (C, Hpad)
        # select each channel's own head: G[e, d] = rn[e, head(d)]
        h2 = lax.broadcasted_iota(jnp.int32, (hpad, c), 0)
        d2 = lax.broadcasted_iota(jnp.int32, (hpad, c), 1)
        lo2 = h2 * dh
        hmask_t = jnp.where(
            (d2 >= lo2) & (d2 < lo2 + dh) & (h2 < num_heads),
            1.0, 0.0)                                                # (Hpad, C) f32
        g = jnp.dot(rn, hmask_t, preferred_element_type=jnp.float32)  # (C, C)
        # pooled[d] = sum_e Wv[e, d] * G[e, d]
        pooled = jnp.sum(wv_ref[...].astype(jnp.float32) * g,
                         axis=0, keepdims=True)                      # (1, C)
        out = jnp.dot(pooled.astype(jnp.bfloat16), wo_ref[...],
                      preferred_element_type=jnp.float32) + bo_ref[...]
        o_ref[...] = out.astype(o_ref.dtype)


def decoder_forward(params, x, *, num_heads, max_tile=512):
    """Pallas Decoder.forward: multi-head attention set pooling, (N, C) -> (1, C)."""
    seed, wq, wk, wv, wo, bo = params
    n, c = x.shape
    assert n >= 1
    assert c % num_heads == 0, "out_channels must be divisible by num_heads"
    dh = c // num_heads
    hpad = 128                       # lane-dense head axis for scores / stats
    assert num_heads <= hpad

    if n <= max_tile:                # whole set in one grid step
        tile_n = max(8, ((n + 7) // 8) * 8)
    else:
        tile_n = max_tile
    n_pad = pl.cdiv(n, tile_n) * tile_n
    grid_n = n_pad // tile_n

    x_b = x.astype(jnp.bfloat16)
    if n_pad != n:                   # row-pad only; channels stay unpadded
        x_b = jnp.zeros((n_pad, c), jnp.bfloat16).at[:n].set(x_b)

    scale = 1.0 / math.sqrt(dh)
    seed_b = seed.astype(jnp.bfloat16)
    wq_b = (wq * scale).astype(jnp.bfloat16)     # fold 1/sqrt(dh) into Wq
    wk_b = wk.astype(jnp.bfloat16)
    wv_b = wv.astype(jnp.bfloat16)
    wo_b = wo.astype(jnp.bfloat16)
    bo_f = bo.astype(jnp.float32)

    kernel = functools.partial(_pma_decoder_kernel, n_valid=n, tile_n=tile_n,
                               c=c, num_heads=num_heads, hpad=hpad)

    def const(i):
        return (0, 0)

    out = pl.pallas_call(
        kernel,
        out_shape=jax.ShapeDtypeStruct((1, c), jnp.float32),
        grid=(grid_n,),
        in_specs=[
            pl.BlockSpec((1, c), const),                  # seed query
            pl.BlockSpec((c, c), const),                  # Wq (pre-scaled)
            pl.BlockSpec((c, c), const),                  # Wk
            pl.BlockSpec((c, c), const),                  # Wv
            pl.BlockSpec((c, c), const),                  # Wo
            pl.BlockSpec((1, c), const),                  # bo
            pl.BlockSpec((tile_n, c), lambda i: (i, 0)),  # X row tile (bf16)
        ],
        out_specs=pl.BlockSpec((1, c), const),
        scratch_shapes=[
            pltpu.VMEM((c, hpad), jnp.bfloat16),   # q-folded score weights
            pltpu.VMEM((1, hpad), jnp.float32),    # running max
            pltpu.VMEM((1, hpad), jnp.float32),    # running denom
            pltpu.VMEM((c, hpad), jnp.float32),    # attention-weighted X accum
        ],
        compiler_params=pltpu.CompilerParams(
            dimension_semantics=("arbitrary",)),   # set axis is a reduction
    )(seed_b, wq_b, wk_b, wv_b, wo_b, bo_f, x_b)
    return out


def init_decoder_params(key, out_channels):
    c = out_channels
    ks = jax.random.split(key, 5)
    limit = math.sqrt(6.0 / (c + c))

    def uni(k):
        return jax.random.uniform(k, (c, c), jnp.float32, -limit, limit)

    wq, wk, wv, wo = uni(ks[0]), uni(ks[1]), uni(ks[2]), uni(ks[3])
    seed = jax.random.normal(ks[4], (1, c), jnp.float32)
    bo = jnp.zeros((1, c), jnp.float32)
    return seed, wq, wk, wv, wo, bo


def _bf16_round(a):
    return a.astype(jnp.bfloat16).astype(jnp.float32)


def decoder_reference(params, x, *, num_heads):
    """Pure-JAX reference for the same set function (matches kernel numerics)."""
    seed, wq, wk, wv, wo, bo = params
    n, c = x.shape
    dh = c // num_heads
    scale = 1.0 / math.sqrt(dh)
    seed_, wq_, wk_, wv_, wo_ = (_bf16_round(seed), _bf16_round(wq * scale),
                                 _bf16_round(wk), _bf16_round(wv), _bf16_round(wo))
    x_ = _bf16_round(x)
    hp = jax.lax.Precision.HIGHEST
    q = jnp.dot(seed_, wq_, precision=hp)                   # (1, c), scale folded
    k = jnp.dot(x_, wk_, precision=hp)                      # (n, c)
    v = jnp.dot(x_, wv_, precision=hp)
    qh = q.reshape(num_heads, dh)
    kh = k.reshape(n, num_heads, dh)
    vh = v.reshape(n, num_heads, dh)
    s = jnp.einsum("nhd,hd->nh", kh, qh, precision=hp)
    a = jax.nn.softmax(s, axis=0)
    pooled = jnp.einsum("nh,nhd->hd", a, vh, precision=hp).reshape(1, c)
    pooled = _bf16_round(pooled)                            # kernel feeds MXU bf16
    return jnp.dot(pooled, wo_, precision=hp) + bo


if __name__ == "__main__":
    key = jax.random.PRNGKey(0)

    # Decoder(name="pma", out_channels=32, num_heads=4) applied to a set of
    # 200 element embeddings (e.g. latent node features from an encoder).
    num_elements = 200
    out_channels = 32
    num_heads = 4

    key, xk, pk, x2k = jax.random.split(key, 4)
    x = jax.random.normal(xk, (num_elements, out_channels), jnp.float32)
    params = init_decoder_params(pk, out_channels)

    out = decoder_forward(params, x, num_heads=num_heads)
    jax.block_until_ready(out)
    assert out.shape == (1, out_channels)
    ref = decoder_reference(params, x, num_heads=num_heads)
    err = float(jnp.max(jnp.abs(out - ref)))
    assert err < 5e-2, f"single-tile max abs err {err}"

    # Also exercise the tiled / online-softmax path (multiple grid steps,
    # padded final tile) to validate the reduction accumulators.
    x2 = jax.random.normal(x2k, (1153, out_channels), jnp.float32)
    out2 = decoder_forward(params, x2, num_heads=num_heads)
    jax.block_until_ready(out2)
    ref2 = decoder_reference(params, x2, num_heads=num_heads)
    err2 = float(jnp.max(jnp.abs(out2 - ref2)))
    assert err2 < 5e-2, f"multi-tile max abs err {err2}"

    print("KERNEL_OK")
</pallas_src>

<mosaic_0001>
module attributes {stable_mosaic.version = 11 : i64} {
  func.func @_pma_decoder_kernel(%arg0: i32, %arg1: memref<1x32xbf16, #tpu.memory_space<vmem>>, %arg2: memref<32x32xbf16, #tpu.memory_space<vmem>>, %arg3: memref<32x32xbf16, #tpu.memory_space<vmem>>, %arg4: memref<32x32xbf16, #tpu.memory_space<vmem>>, %arg5: memref<32x32xbf16, #tpu.memory_space<vmem>>, %arg6: memref<1x32xf32, #tpu.memory_space<vmem>>, %arg7: memref<200x32xbf16, #tpu.memory_space<vmem>>, %arg8: memref<1x32xf32, #tpu.memory_space<vmem>>, %arg9: memref<32x128xbf16, #tpu.memory_space<vmem>>, %arg10: memref<1x128xf32, #tpu.memory_space<vmem>>, %arg11: memref<1x128xf32, #tpu.memory_space<vmem>>, %arg12: memref<32x128xf32, #tpu.memory_space<vmem>>) attributes {dimension_semantics = [#tpu.dimension_semantics<arbitrary>], iteration_bounds = array<i64: 1>, scalar_prefetch = 0 : i64, scratch_operands = 4 : i64, tpu.core_type = #tpu.core_type<tc>, window_params = [{pipeline_mode = #tpu.pipeline_mode<synchronous>, transform_indices = @transform_0, window_bounds = array<i64: 1, 32>}, {pipeline_mode = #tpu.pipeline_mode<synchronous>, transform_indices = @transform_1, window_bounds = array<i64: 32, 32>}, {pipeline_mode = #tpu.pipeline_mode<synchronous>, transform_indices = @transform_2, window_bounds = array<i64: 32, 32>}, {pipeline_mode = #tpu.pipeline_mode<synchronous>, transform_indices = @transform_3, window_bounds = array<i64: 32, 32>}, {pipeline_mode = #tpu.pipeline_mode<synchronous>, transform_indices = @transform_4, window_bounds = array<i64: 32, 32>}, {pipeline_mode = #tpu.pipeline_mode<synchronous>, transform_indices = @transform_5, window_bounds = array<i64: 1, 32>}, {transform_indices = @transform_6, window_bounds = array<i64: 200, 32>}, {pipeline_mode = #tpu.pipeline_mode<synchronous>, transform_indices = @transform_7, window_bounds = array<i64: 1, 32>}]} {
    %c0_i32 = arith.constant 0 : i32
    %0 = arith.cmpi eq, %arg0, %c0_i32 : i32
    %1 = arith.extui %0 : i1 to i32
    %c0_i32_0 = arith.constant 0 : i32
    %2 = arith.cmpi ne, %1, %c0_i32_0 : i32
    scf.if %2 {
      %42 = tpu.iota {dimensions = array<i32: 0>} : vector<32x128xi32>
      %43 = tpu.iota {dimensions = array<i32: 1>} : vector<32x128xi32>
      %c8_i32 = arith.constant 8 : i32
      %44 = vector.broadcast %c8_i32 : i32 to vector<32x128xi32>
      %45 = arith.muli %43, %44 : vector<32x128xi32>
      %46 = arith.cmpi sge, %42, %45 : vector<32x128xi32>
      %c8_i32_23 = arith.constant 8 : i32
      %47 = vector.broadcast %c8_i32_23 : i32 to vector<32x128xi32>
      %48 = arith.addi %45, %47 : vector<32x128xi32>
      %49 = arith.cmpi slt, %42, %48 : vector<32x128xi32>
      %50 = arith.andi %46, %49 : vector<32x128xi1>
      %c4_i32 = arith.constant 4 : i32
      %51 = vector.broadcast %c4_i32 : i32 to vector<32x128xi32>
      %52 = arith.cmpi slt, %43, %51 : vector<32x128xi32>
      %53 = arith.andi %50, %52 : vector<32x128xi1>
      %cst_24 = arith.constant 1.000000e+00 : f32
      %cst_25 = arith.constant 0.000000e+00 : f32
      %54 = vector.broadcast %cst_24 : f32 to vector<32x128xf32>
      %55 = vector.broadcast %cst_25 : f32 to vector<32x128xf32>
      %56 = arith.select %53, %54, %55 : vector<32x128xi1>, vector<32x128xf32>
      %57 = arith.truncf %56 : vector<32x128xf32> to vector<32x128xbf16>
      %c0_26 = arith.constant 0 : index
      %c0_27 = arith.constant 0 : index
      %58 = vector.load %arg1[%c0_26, %c0_27] : memref<1x32xbf16, #tpu.memory_space<vmem>>, vector<1x32xbf16>
      %c0_28 = arith.constant 0 : index
      %c0_29 = arith.constant 0 : index
      %59 = vector.load %arg2[%c0_28, %c0_29] : memref<32x32xbf16, #tpu.memory_space<vmem>>, vector<32x32xbf16>
      %cst_30 = arith.constant dense<0.000000e+00> : vector<1x32xf32>
      %60 = tpu.matmul %58, %59, %cst_30 {dimension_numbers = #tpu.dot_dimension_numbers<[1], [0], [0], [1], [0, 0, 1, 1], [], []>} : vector<1x32xbf16>, vector<32x32xbf16>, vector<1x32xf32> -> vector<1x32xf32>
      %c0_31 = arith.constant 0 : index
      %c0_32 = arith.constant 0 : index
      %61 = vector.load %arg3[%c0_31, %c0_32] : memref<32x32xbf16, #tpu.memory_space<vmem>>, vector<32x32xbf16>
      %62 = arith.extf %61 : vector<32x32xbf16> to vector<32x32xf32>
      %63 = vector.broadcast %60 : vector<1x32xf32> to vector<32x32xf32>
      %64 = arith.mulf %62, %63 : vector<32x32xf32>
      %65 = arith.truncf %64 : vector<32x32xf32> to vector<32x32xbf16>
      %cst_33 = arith.constant dense<0.000000e+00> : vector<32x128xf32>
      %66 = tpu.matmul %65, %57, %cst_33 {dimension_numbers = #tpu.dot_dimension_numbers<[1], [0], [0], [1], [0, 0, 1, 1], [], []>} : vector<32x32xbf16>, vector<32x128xbf16>, vector<32x128xf32> -> vector<32x128xf32>
      %67 = arith.truncf %66 : vector<32x128xf32> to vector<32x128xbf16>
      %c0_34 = arith.constant 0 : index
      %c0_35 = arith.constant 0 : index
      %68 = vector.load %arg9[%c0_34, %c0_35] : memref<32x128xbf16, #tpu.memory_space<vmem>>, vector<32x128xbf16>
      tpu.vector_store %arg9[%c0_34, %c0_35], %67 {strides = array<i32>} : memref<32x128xbf16, #tpu.memory_space<vmem>>, vector<32x128xbf16>,
      %cst_36 = arith.constant 0xFF800000 : f32
      %69 = vector.broadcast %cst_36 : f32 to vector<1x128xf32>
      %c0_37 = arith.constant 0 : index
      %c0_38 = arith.constant 0 : index
      %70 = vector.load %arg10[%c0_37, %c0_38] : memref<1x128xf32, #tpu.memory_space<vmem>>, vector<1x128xf32>
      tpu.vector_store %arg10[%c0_37, %c0_38], %69 {strides = array<i32>} : memref<1x128xf32, #tpu.memory_space<vmem>>, vector<1x128xf32>,
      %cst_39 = arith.constant 0.000000e+00 : f32
      %71 = vector.broadcast %cst_39 : f32 to vector<1x128xf32>
      %c0_40 = arith.constant 0 : index
      %c0_41 = arith.constant 0 : index
      %72 = vector.load %arg11[%c0_40, %c0_41] : memref<1x128xf32, #tpu.memory_space<vmem>>, vector<1x128xf32>
      tpu.vector_store %arg11[%c0_40, %c0_41], %71 {strides = array<i32>} : memref<1x128xf32, #tpu.memory_space<vmem>>, vector<1x128xf32>,
      %cst_42 = arith.constant 0.000000e+00 : f32
      %73 = vector.broadcast %cst_42 : f32 to vector<32x128xf32>
      %c0_43 = arith.constant 0 : index
      %c0_44 = arith.constant 0 : index
      %74 = vector.load %arg12[%c0_43, %c0_44] : memref<32x128xf32, #tpu.memory_space<vmem>>, vector<32x128xf32>
      tpu.vector_store %arg12[%c0_43, %c0_44], %73 {strides = array<i32>} : memref<32x128xf32, #tpu.memory_space<vmem>>, vector<32x128xf32>,
    } else {
    }
    %c0 = arith.constant 0 : index
    %c0_1 = arith.constant 0 : index
    %3 = vector.load %arg7[%c0, %c0_1] : memref<200x32xbf16, #tpu.memory_space<vmem>>, vector<200x32xbf16>
    %c0_2 = arith.constant 0 : index
    %c0_3 = arith.constant 0 : index
    %4 = vector.load %arg9[%c0_2, %c0_3] : memref<32x128xbf16, #tpu.memory_space<vmem>>, vector<32x128xbf16>
    %cst = arith.constant dense<0.000000e+00> : vector<200x128xf32>
    %5 = tpu.matmul %3, %4, %cst {dimension_numbers = #tpu.dot_dimension_numbers<[1], [0], [0], [1], [0, 0, 1, 1], [], []>} : vector<200x32xbf16>, vector<32x128xbf16>, vector<200x128xf32> -> vector<200x128xf32>
    %6 = tpu.iota {dimensions = array<i32: 0>} : vector<200x1xi32>
    %c200_i32 = arith.constant 200 : i32
    %7 = arith.muli %arg0, %c200_i32 : i32
    %8 = vector.broadcast %7 : i32 to vector<200x1xi32>
    %9 = arith.addi %6, %8 : vector<200x1xi32>
    %c200_i32_4 = arith.constant 200 : i32
    %10 = vector.broadcast %c200_i32_4 : i32 to vector<200x1xi32>
    %11 = arith.cmpi slt, %9, %10 : vector<200x1xi32>
    %cst_5 = arith.constant 0xFF800000 : f32
    %12 = vector.shape_cast %11 : vector<200x1xi1> to vector<200x1xi1>
    %13 = vector.broadcast %12 : vector<200x1xi1> to vector<200x128xi1>
    %14 = vector.broadcast %cst_5 : f32 to vector<200x128xf32>
    %15 = arith.select %13, %5, %14 : vector<200x128xi1>, vector<200x128xf32>
    %c0_6 = arith.constant 0 : index
    %c0_7 = arith.constant 0 : index
    %16 = vector.load %arg10[%c0_6, %c0_7] : memref<1x128xf32, #tpu.memory_space<vmem>>, vector<1x128xf32>
    %cst_8 = arith.constant dense<0xFF800000> : vector<128xf32>
    %17 = vector.multi_reduction <maximumf>, %15, %cst_8 [0] : vector<200x128xf32> to vector<128xf32>
    %18 = vector.shape_cast %17 : vector<128xf32> to vector<1x128xf32>
    %19 = arith.maximumf %16, %18 : vector<1x128xf32>
    %20 = arith.subf %16, %19 : vector<1x128xf32>
    %21 = math.exp %20 : vector<1x128xf32>
    %22 = vector.broadcast %19 : vector<1x128xf32> to vector<200x128xf32>
    %23 = arith.subf %15, %22 : vector<200x128xf32>
    %24 = math.exp %23 : vector<200x128xf32>
    %c0_9 = arith.constant 0 : index
    %c0_10 = arith.constant 0 : index
    %25 = vector.load %arg11[%c0_9, %c0_10] : memref<1x128xf32, #tpu.memory_space<vmem>>, vector<1x128xf32>
    %26 = arith.mulf %21, %25 : vector<1x128xf32>
    %cst_11 = arith.constant dense<0.000000e+00> : vector<128xf32>
    %27 = vector.multi_reduction <add>, %24, %cst_11 [0] : vector<200x128xf32> to vector<128xf32>
    %28 = vector.shape_cast %27 : vector<128xf32> to vector<1x128xf32>
    %29 = arith.addf %26, %28 : vector<1x128xf32>
    %c0_12 = arith.constant 0 : index
    %c0_13 = arith.constant 0 : index
    %30 = vector.load %arg11[%c0_12, %c0_13] : memref<1x128xf32, #tpu.memory_space<vmem>>, vector<1x128xf32>
    tpu.vector_store %arg11[%c0_12, %c0_13], %29 {strides = array<i32>} : memref<1x128xf32, #tpu.memory_space<vmem>>, vector<1x128xf32>,
    %31 = arith.truncf %24 : vector<200x128xf32> to vector<200x128xbf16>
    %cst_14 = arith.constant dense<0.000000e+00> : vector<32x128xf32>
    %32 = tpu.matmul %3, %31, %cst_14 {dimension_numbers = #tpu.dot_dimension_numbers<[0], [0], [1], [1], [0, 1, 1, 1], [], []>} : vector<200x32xbf16>, vector<200x128xbf16>, vector<32x128xf32> -> vector<32x128xf32>
    %c0_15 = arith.constant 0 : index
    %c0_16 = arith.constant 0 : index
    %33 = vector.load %arg12[%c0_15, %c0_16] : memref<32x128xf32, #tpu.memory_space<vmem>>, vector<32x128xf32>
    %34 = vector.broadcast %21 : vector<1x128xf32> to vector<32x128xf32>
    %35 = arith.mulf %34, %33 : vector<32x128xf32>
    %36 = arith.addf %35, %32 : vector<32x128xf32>
    %c0_17 = arith.constant 0 : index
    %c0_18 = arith.constant 0 : index
    %37 = vector.load %arg12[%c0_17, %c0_18] : memref<32x128xf32, #tpu.memory_space<vmem>>, vector<32x128xf32>
    tpu.vector_store %arg12[%c0_17, %c0_18], %36 {strides = array<i32>} : memref<32x128xf32, #tpu.memory_space<vmem>>, vector<32x128xf32>,
    %c0_19 = arith.constant 0 : index
    %c0_20 = arith.constant 0 : index
    %38 = vector.load %arg10[%c0_19, %c0_20] : memref<1x128xf32, #tpu.memory_space<vmem>>, vector<1x128xf32>
    tpu.vector_store %arg10[%c0_19, %c0_20], %19 {strides = array<i32>} : memref<1x128xf32, #tpu.memory_space<vmem>>, vector<1x128xf32>,
    %c0_i32_21 = arith.constant 0 : i32
    %39 = arith.cmpi eq, %arg0, %c0_i32_21 : i32
    %40 = arith.extui %39 : i1 to i32
    %c0_i32_22 = arith.constant 0 : i32
    %41 = arith.cmpi ne, %40, %c0_i32_22 : i32
    scf.if %41 {
      %c0_23 = arith.constant 0 : index
      %c0_24 = arith.constant 0 : index
      %42 = vector.load %arg11[%c0_23, %c0_24] : memref<1x128xf32, #tpu.memory_space<vmem>>, vector<1x128xf32>
      %43 = tpu.reciprocal %42 {approx = true} : vector<1x128xf32> -> vector<1x128xf32>
      %c0_25 = arith.constant 0 : index
      %c0_26 = arith.constant 0 : index
      %44 = vector.load %arg12[%c0_25, %c0_26] : memref<32x128xf32, #tpu.memory_space<vmem>>, vector<32x128xf32>
      %45 = vector.broadcast %43 : vector<1x128xf32> to vector<32x128xf32>
      %46 = arith.mulf %44, %45 : vector<32x128xf32>
      %47 = tpu.iota {dimensions = array<i32: 0>} : vector<128x32xi32>
      %48 = tpu.iota {dimensions = array<i32: 1>} : vector<128x32xi32>
      %c8_i32 = arith.constant 8 : i32
      %49 = vector.broadcast %c8_i32 : i32 to vector<128x32xi32>
      %50 = arith.muli %47, %49 : vector<128x32xi32>
      %51 = arith.cmpi sge, %48, %50 : vector<128x32xi32>
      %c8_i32_27 = arith.constant 8 : i32
      %52 = vector.broadcast %c8_i32_27 : i32 to vector<128x32xi32>
      %53 = arith.addi %50, %52 : vector<128x32xi32>
      %54 = arith.cmpi slt, %48, %53 : vector<128x32xi32>
      %55 = arith.andi %51, %54 : vector<128x32xi1>
      %c4_i32 = arith.constant 4 : i32
      %56 = vector.broadcast %c4_i32 : i32 to vector<128x32xi32>
      %57 = arith.cmpi slt, %47, %56 : vector<128x32xi32>
      %58 = arith.andi %55, %57 : vector<128x32xi1>
      %cst_28 = arith.constant 1.000000e+00 : f32
      %cst_29 = arith.constant 0.000000e+00 : f32
      %59 = vector.broadcast %cst_28 : f32 to vector<128x32xf32>
      %60 = vector.broadcast %cst_29 : f32 to vector<128x32xf32>
      %61 = arith.select %58, %59, %60 : vector<128x32xi1>, vector<128x32xf32>
      %cst_30 = arith.constant dense<0.000000e+00> : vector<32x32xf32>
      %62 = tpu.matmul %46, %61, %cst_30 {dimension_numbers = #tpu.dot_dimension_numbers<[1], [0], [0], [1], [0, 0, 1, 1], [], []>} : vector<32x128xf32>, vector<128x32xf32>, vector<32x32xf32> -> vector<32x32xf32>
      %c0_31 = arith.constant 0 : index
      %c0_32 = arith.constant 0 : index
      %63 = vector.load %arg4[%c0_31, %c0_32] : memref<32x32xbf16, #tpu.memory_space<vmem>>, vector<32x32xbf16>
      %64 = arith.extf %63 : vector<32x32xbf16> to vector<32x32xf32>
      %65 = arith.mulf %64, %62 : vector<32x32xf32>
      %cst_33 = arith.constant dense<0.000000e+00> : vector<32xf32>
      %66 = vector.multi_reduction <add>, %65, %cst_33 [0] : vector<32x32xf32> to vector<32xf32>
      %67 = vector.shape_cast %66 : vector<32xf32> to vector<1x32xf32>
      %68 = arith.truncf %67 : vector<1x32xf32> to vector<1x32xbf16>
      %c0_34 = arith.constant 0 : index
      %c0_35 = arith.constant 0 : index
      %69 = vector.load %arg5[%c0_34, %c0_35] : memref<32x32xbf16, #tpu.memory_space<vmem>>, vector<32x32xbf16>
      %cst_36 = arith.constant dense<0.000000e+00> : vector<1x32xf32>
      %70 = tpu.matmul %68, %69, %cst_36 {dimension_numbers = #tpu.dot_dimension_numbers<[1], [0], [0], [1], [0, 0, 1, 1], [], []>} : vector<1x32xbf16>, vector<32x32xbf16>, vector<1x32xf32> -> vector<1x32xf32>
      %c0_37 = arith.constant 0 : index
      %c0_38 = arith.constant 0 : index
      %71 = vector.load %arg6[%c0_37, %c0_38] : memref<1x32xf32, #tpu.memory_space<vmem>>, vector<1x32xf32>
      %72 = arith.addf %70, %71 : vector<1x32xf32>
      %c0_39 = arith.constant 0 : index
      %c0_40 = arith.constant 0 : index
      %73 = vector.load %arg8[%c0_39, %c0_40] : memref<1x32xf32, #tpu.memory_space<vmem>>, vector<1x32xf32>
      tpu.vector_store %arg8[%c0_39, %c0_40], %72 {strides = array<i32>} : memref<1x32xf32, #tpu.memory_space<vmem>>, vector<1x32xf32>,
    } else {
    }
    return
  }
  func.func @transform_0(%arg0: i32) -> (i32, i32) {
    %c0_i32 = arith.constant 0 : i32
    %c0_i32_0 = arith.constant 0 : i32
    %c0_i32_1 = arith.constant 0 : i32
    return %c0_i32, %c0_i32_0 : i32, i32
  }
  func.func @transform_1(%arg0: i32) -> (i32, i32) {
    %c0_i32 = arith.constant 0 : i32
    %c0_i32_0 = arith.constant 0 : i32
    %c0_i32_1 = arith.constant 0 : i32
    return %c0_i32, %c0_i32_0 : i32, i32
  }
  func.func @transform_2(%arg0: i32) -> (i32, i32) {
    %c0_i32 = arith.constant 0 : i32
    %c0_i32_0 = arith.constant 0 : i32
    %c0_i32_1 = arith.constant 0 : i32
    return %c0_i32, %c0_i32_0 : i32, i32
  }
  func.func @transform_3(%arg0: i32) -> (i32, i32) {
    %c0_i32 = arith.constant 0 : i32
    %c0_i32_0 = arith.constant 0 : i32
    %c0_i32_1 = arith.constant 0 : i32
    return %c0_i32, %c0_i32_0 : i32, i32
  }
  func.func @transform_4(%arg0: i32) -> (i32, i32) {
    %c0_i32 = arith.constant 0 : i32
    %c0_i32_0 = arith.constant 0 : i32
    %c0_i32_1 = arith.constant 0 : i32
    return %c0_i32, %c0_i32_0 : i32, i32
  }
  func.func @transform_5(%arg0: i32) -> (i32, i32) {
    %c0_i32 = arith.constant 0 : i32
    %c0_i32_0 = arith.constant 0 : i32
    %c0_i32_1 = arith.constant 0 : i32
    return %c0_i32, %c0_i32_0 : i32, i32
  }
  func.func @transform_6(%arg0: i32) -> (i32, i32) {
    %c0_i32 = arith.constant 0 : i32
    %c0_i32_0 = arith.constant 0 : i32
    return %arg0, %c0_i32 : i32, i32
  }
  func.func @transform_7(%arg0: i32) -> (i32, i32) {
    %c0_i32 = arith.constant 0 : i32
    %c0_i32_0 = arith.constant 0 : i32
    %c0_i32_1 = arith.constant 0 : i32
    return %c0_i32, %c0_i32_0 : i32, i32
  }
}

</mosaic_0001>

<bundles_post_ra>
// kernel: tpu_custom_call.1
= control target key start
LH: loop header
LB: loop body
LE: loop exit
PB: predicated region body
PF: predicated region fallthrough
CT: control target
= control target key end

     0   :  { %v32_v1 = vlaneseq  ;;  %v1584_v2 = vmov 0.0   ;;  %vm1585_vm0 = vmmov 0   ;;  %vm81_vm1 = vcmask 261120   ;;  %s1995_s0 = inlined_call_operand.vmem [shape: bf16[1,32], index: 0, kind: input, shape index: {}]   ;;  %s1996_s1 = inlined_call_operand.vmem [shape: bf16[32,32], index: 1, kind: input, shape index: {}]   ;;  %s1997_s2 = inlined_call_operand.vmem [shape: bf16[32,32], index: 2, kind: input, shape index: {}]   ;;  %s1998_s3 = inlined_call_operand.vmem [shape: bf16[32,32], index: 3, kind: input, shape index: {}]   ;;  %s1999_s4 = inlined_call_operand.vmem [shape: bf16[32,32], index: 4, kind: input, shape index: {}]   ;;  %s2000_s5 = inlined_call_operand.vmem [shape: f32[1,32], index: 5, kind: input, shape index: {}]   ;;  %s2001_s6 = inlined_call_operand.vmem [shape: bf16[200,32], index: 6, kind: input, shape index: {}]   ;;  %s2002_s7 = inlined_call_operand.hbm [shape: f32[1,32], index: 7, kind: output, shape index: {}]  }
   0x1   :  { %v1489_v0 = vld [vmem:[%s1996_s1 + $0x8] sm:$0xff]   ;;  %1394 = vmatprep.subr.bf16.mxu1 %v1584_v2  ;;  %219 = vst [vmem:[#allocation4] sm:$0x1] %v1584_v2  ;;  %1410 = vmatprep.subr.bf16.mxu0 %v1584_v2  ;;  %v1490_v3 = vld [vmem:[%s1996_s1] sm:$0xff]   ;;  %v1586_v11 = vmov 1.0|1.0  }
   0x2   :  { %1395 = vmatpush3.bf16.msra.mxu1 %v1489_v0  ;;  %1398 = vmatprep.mubr.msk.bf16.mxu1 %vm1585_vm0, %v1584_v2  ;;  %v1642_v4 = vshrl.u32 %v32_v1, 7  ;;  %v1644_v5 = vand.u32 127, %v32_v1  ;;  %v64_v6 = vld [vmem:[%s1995_s0] sm:$0x1] }
   0x3   :  { %1396 = vmatprep.subr.bf16.mxu1 %v1584_v2  ;;  %1414 = vmatprep.mubr.msk.bf16.mxu0 %vm1585_vm0, %v1584_v2 }
   0x4   :  { %v35_v7 = vadd.s32 16, %v1642_v4  ;;  %v36_v8 = vadd.s32 24, %v1642_v4  ;;  %v39_v9 = vmul.u32 8, %v1644_v5  ;;  %vm53_vm3 = vcmp.lt.s32.totalorder %v1644_v5, 4 }
   0x6   :  { %1397 = vmatpush3.bf16.msra.mxu1 %v1490_v3  ;;  %vm42_vm2 = vcmp.ge.s32.totalorder %v35_v7, %v39_v9  ;;  %v44_v10 = vadd.s32 8, %v39_v9  ;;  %vm43_vm4 = vcmp.ge.s32.totalorder %v36_v8, %v39_v9 }
   0x8   :  { %vm47_vm5 = vcmp.lt.s32.totalorder %v35_v7, %v44_v10  ;;  %vm48_vm6 = vcmp.lt.s32.totalorder %v36_v8, %v44_v10 }
   0x9   :  { %1399 = vmatmul.mubr.msk.bf16.vlgmr.msra.gmra.mxu1 %vm81_vm1, %v64_v6  ;;  %vm51_vm7 = vmand %vm42_vm2, %vm47_vm5 }
   0xa   :  { %vm52_vm8 = vmand %vm43_vm4, %vm48_vm6 }
   0xb   :  { %vm56_vm9 = vmand %vm51_vm7, %vm53_vm3 }
   0xc   :  { %vm57_vm10 = vmand %vm52_vm8, %vm53_vm3 }
   0xd   :  { %vm1287_vm11 = vmpackc.low %vm57_vm10, %vm56_vm9 }
   0xe   :  { %1402 = vmatprep.subr.msk.bf16.mxu1 %vm1287_vm11, %v1586_v11 }
   0xf   :  { %1403 = vmatpush3.bf16.msk.msra.mxu1 %vm1287_vm11, %v1586_v11 }
  0x10   :  { %12 = vsyncpa [#allocation7], 0  ;;  %v34_v12 = vadd.s32 8, %v1642_v4  ;;  %vm40_vm12 = vcmp.ge.s32.totalorder %v1642_v4, %v39_v9  ;;  %vm45_vm14 = vcmp.lt.s32.totalorder %v1642_v4, %v44_v10  ;;  %v1336_v13 = vld [vmem:[%s1997_s2] sm:$0xff]   ;;  %v1361_v14 = vld [vmem:[%s1997_s2 + $0x8] sm:$0xff]   ;;  %v1675_v15 = vsub.s32 0, %v1642_v4 }
  0x11   :  { %vm49_vm2 = vmand %vm40_vm12, %vm45_vm14  ;;  %v1337_v16 = vunpack.c.l.bf16 %v1336_v13  ;;  %v1338_v17 = vunpack.c.h.bf16 %v1336_v13  ;;  %v1341_v18 = vunpack.c.l.bf16 %v1361_v14  ;;  %v1342_v19 = vunpack.c.h.bf16 %v1361_v14  ;;  %v1493_v31 = vld [vmem:[%s2001_s6] sm:$0xff]   ;;  %v1494_v32 = vld [vmem:[%s2001_s6 + $0x8] sm:$0xff]   ;;  %s1590_s15 = smov [#allocation6]  }
  0x12   :  { %vm41_vm13 = vcmp.ge.s32.totalorder %v34_v12, %v39_v9  ;;  %vm46_vm15 = vcmp.lt.s32.totalorder %v34_v12, %v44_v10  ;;  %vm54_vm5 = vmand %vm49_vm2, %vm53_vm3  ;;  %833 = vxpose.xlu1.c.b16.start [1/8] (narrow) %v1493_v31, 32  ;;  %v1495_v33 = vld [vmem:[%s2001_s6 + $0x10] sm:$0xff]   ;;  %v1496_v34 = vld [vmem:[%s2001_s6 + $0x18] sm:$0xff]   ;;  %v1587_v52 = vmov -inf   ;;  %v1588_v12 = vmov 0   ;;  %s1276_s16 = sshll.u32 %s1590_s15, 4  ;;  %s1277_s16 = int_to_ptr.vmem [resolvable:$true] %s1276_s16 }
  0x13   :  { %vm50_vm4 = vmand %vm41_vm13, %vm46_vm15  ;;  %v1497_v35 = vld [vmem:[%s2001_s6 + $0x20] sm:$0xff]   ;;  %v1498_v36 = vld [vmem:[%s2001_s6 + $0x28] sm:$0xff]   ;;  %218 = vst [vmem:[#allocation3] sm:$0x1] %v1587_v52  ;;  %vm872_vm8 = vcmask 1043456   ;;  %vm1049_vm12 = vcmp.lt.s32.totalorder %v1642_v4, 4  ;;  %p1567_p1 = scmp.lt.s32.totalorder %s1277_s16, %s1277_s16 }
  0x14   :  { %vm55_vm6 = vmand %vm50_vm4, %vm53_vm3  ;;  %v1499_v37 = vld [vmem:[%s2001_s6 + $0x30] sm:$0xff]   ;;  %v1500_v38 = vld [vmem:[%s2001_s6 + $0x38] sm:$0xff]   ;;  %vm865_vm3 = vcmask 588800   ;;  %s1562_s17 = scalar_lea.vmem %s1277_s16, 16  ;;  %s1566_s18 = scalar_lea.vmem %s1277_s16, 32 }
  0x15   :  { %vm1289_vm7 = vmpackc.low %vm55_vm6, %vm54_vm5  ;;  %v1501_v39 = vld [vmem:[%s2001_s6 + $0x40] sm:$0xff]   ;;  %v1502_v40 = vld [vmem:[%s2001_s6 + $0x48] sm:$0xff]   ;;  %p1563_p0 = scmp.ne.s32.totalorder %s1277_s16, %s1562_s17  ;;  %p1568_p2 = scmp.lt.s32.totalorder %s1566_s18, %s1562_s17 }
  0x16   :  { %1404 = vmatprep.subr.msk.bf16.mxu1 %vm1289_vm7, %v1586_v11  ;;  %834 = vxpose.xlu1.c.b16.cont [2/8] (narrow) %v1494_v32, 32  ;;  %v1503_v41 = vld [vmem:[%s2001_s6 + $0x50] sm:$0xff]   ;;  %v1504_v42 = vld [vmem:[%s2001_s6 + $0x58] sm:$0xff]   ;;  %v1505_v43 = vld [vmem:[%s2001_s6 + $0x60] ss:$0 sps:$4 sm:$0xff]  }
  0x17   :  { %1405 = vmatpush3.bf16.msk.msra.mxu1 %vm1289_vm7, %v1586_v11  ;;  %849 = vxpose.xlu0.c.b16.start [1/5] (short) (narrow) %v1501_v39, 32  ;;  %p1569_p3 = por %p1568_p2, %p1567_p1 }
  0x18   :  { %876 = vmatprep.subr.bf16.mxu1 %v1588_v12 }
  0x19   :  { %p1570_p4 = pnand %p1569_p3, %p1563_p0 }
  0x1a   :  { %835 = vxpose.xlu1.c.b16.cont [3/8] (narrow) %v1495_v33, 32 }
  0x1b   :  { %850 = vxpose.xlu0.c.b16.cont [2/5] (short) (narrow) %v1502_v40, 32 }
  0x1e   :  { %836 = vxpose.xlu1.c.b16.cont [4/8] (narrow) %v1496_v34, 32 }
  0x1f   :  { %851 = vxpose.xlu0.c.b16.cont [3/5] (short) (narrow) %v1503_v41, 32 }
  0x22   :  { %837 = vxpose.xlu1.c.b16.cont [5/8] (narrow) %v1497_v35, 32 }
  0x23   :  { %852 = vxpose.xlu0.c.b16.cont [4/5] (short) (narrow) %v1504_v42, 32 }
  0x26   :  { %838 = vxpose.xlu1.c.b16.cont [6/8] (narrow) %v1498_v36, 32 }
  0x27   :  { %853 = vxpose.xlu0.c.b16.end [5/5] (short) (narrow) %v1505_v43, 32 }
  0x2a   :  { %839 = vxpose.xlu1.c.b16.cont [7/8] (narrow) %v1499_v37, 32 }
  0x2e   :  { %840 = vxpose.xlu1.c.b16.end [8/8] (narrow) %v1500_v38, 32 }
  0xc9   :  { %v119_v20 = vpop.f32.mrf.mxu1 }
  0xca   :  { %v136_v21 = vrot.slane %v119_v20, %v1675_v15 }
  0xcb   :  { %v1400_v22 = vpop.f32.mrf.mxu1 }
  0xcc   :  { %v137_v23 = vmul.f32 %v1337_v16, %v136_v21  ;;  %v138_v24 = vmul.f32 %v1338_v17, %v136_v21  ;;  %v139_v25 = vmul.f32 %v1341_v18, %v136_v21  ;;  %v140_v26 = vmul.f32 %v1342_v19, %v136_v21 }
  0xcd   :  { %v122_v27 = vpop.f32.mrf.mxu1 }
  0xce   :  { %v142_v28 = vpack.c.bf16 %v140_v26, %v139_v25  ;;  %v141_v29 = vpack.c.bf16 %v138_v24, %v137_v23 }
  0xcf   :  { %v1401_v30 = vpop.f32.mrf.mxu1 }
  0xd0   :  { %1406 = vmatprep.mubr.msk.bf16.mxu1 %vm81_vm1, %v141_v29 }
  0xd1   :  { %1407 = vmatmul.mubr.msk.bf16.vlgmr.msra.gmra.mxu1 %vm81_vm1, %v142_v28 }
 0x191   :  { %v1408_v44 = vpop.f32.mrf.mxu1 }
 0x193   :  { %v183_v45 = vpop.f32.mrf.mxu1 }
 0x195   :  { %v1409_v46 = vpop.f32.mrf.mxu1 }
 0x196   :  { %v1351_v47 = vpack.c.bf16 %v1409_v46, %v1408_v44 }
 0x197   :  { %v186_v48 = vpop.f32.mrf.mxu1 }
 0x198   :  { %1362 = vst [vmem:[#allocation2 + $0x8] sm:$0xff] %v1351_v47   ;;  %v1346_v49 = vpack.c.bf16 %v186_v48, %v183_v45 }
 0x19a   :  { %1347 = vst [vmem:[#allocation2] sm:$0xff] %v1346_v49  }
 0x19f   :  { %v1491_v50 = vld [vmem:[#allocation2 + $0x8] sm:$0xff]  }
 0x1a0   :  { %1411 = vmatpush3.bf16.msra.mxu0 %v1491_v50 }
 0x1a1   :  { %1412 = vmatprep.subr.bf16.mxu0 %v1584_v2  ;;  %v1492_v51 = vld [vmem:[#allocation2] sm:$0xff]  }
 0x1a4   :  { %1413 = vmatpush3.bf16.msra.mxu0 %v1492_v51 }
 0x1a7   :  { %1415 = vmatmul.mubr.msk.bf16.vlgmr.msra.gmra.mxu0 %vm81_vm1, %v1493_v31 }
 0x1a8   :  { %1418 = vmatprep.mubr.msk.bf16.mxu0 %vm1585_vm0, %v1584_v2 }
 0x1af   :  { %1419 = vmatmul.mubr.msk.bf16.gmra.mxu0 %vm81_vm1, %v1494_v32 }
 0x1b0   :  { %1422 = vmatprep.mubr.msk.bf16.mxu0 %vm1585_vm0, %v1584_v2 }
 0x1b7   :  { %1423 = vmatmul.mubr.msk.bf16.gmra.mxu0 %vm81_vm1, %v1495_v33 }
 0x1b8   :  { %1426 = vmatprep.mubr.msk.bf16.mxu0 %vm1585_vm0, %v1584_v2 }
 0x1bf   :  { %1427 = vmatmul.mubr.msk.bf16.gmra.mxu0 %vm81_vm1, %v1496_v34  ;;  %v857_v34 = vpop.trf.xlu0 }
 0x1c0   :  { %1430 = vmatprep.mubr.msk.bf16.mxu0 %vm1585_vm0, %v1584_v2  ;;  %1325 = vmatprep.mubr.msk.bf16.mxu1 %vm865_vm3, %v857_v34 }
 0x1c7   :  { %1431 = vmatmul.mubr.msk.bf16.gmra.mxu0 %vm81_vm1, %v1497_v35 }
 0x1c8   :  { %1434 = vmatprep.mubr.msk.bf16.mxu0 %vm1585_vm0, %v1584_v2 }
 0x1cf   :  { %1435 = vmatmul.mubr.msk.bf16.gmra.mxu0 %vm81_vm1, %v1498_v36 }
 0x1d0   :  { %1438 = vmatprep.mubr.msk.bf16.mxu0 %vm1585_vm0, %v1584_v2 }
 0x1d7   :  { %1439 = vmatmul.mubr.msk.bf16.gmra.mxu0 %vm81_vm1, %v1499_v37 }
 0x1d8   :  { %1442 = vmatprep.mubr.msk.bf16.mxu0 %vm1585_vm0, %v1584_v2 }
 0x1df   :  { %1443 = vmatmul.mubr.msk.bf16.gmra.mxu0 %vm81_vm1, %v1500_v38 }
 0x1e0   :  { %1446 = vmatprep.mubr.msk.bf16.mxu0 %vm1585_vm0, %v1584_v2 }
 0x1e7   :  { %1447 = vmatmul.mubr.msk.bf16.gmra.mxu0 %vm81_vm1, %v1501_v39 }
 0x1e8   :  { %1450 = vmatprep.mubr.msk.bf16.mxu0 %vm1585_vm0, %v1584_v2 }
 0x1ef   :  { %1451 = vmatmul.mubr.msk.bf16.gmra.mxu0 %vm81_vm1, %v1502_v40 }
 0x1f0   :  { %1454 = vmatprep.mubr.msk.bf16.mxu0 %vm1585_vm0, %v1584_v2 }
 0x1f7   :  { %1455 = vmatmul.mubr.msk.bf16.gmra.mxu0 %vm81_vm1, %v1503_v41 }
 0x1f8   :  { %1458 = vmatprep.mubr.msk.bf16.mxu0 %vm1585_vm0, %v1584_v2 }
 0x1ff   :  { %1459 = vmatmul.mubr.msk.bf16.gmra.mxu0 %vm81_vm1, %v1504_v42 }
 0x200   :  { %1462 = vmatprep.mubr.msk.bf16.mxu0 %vm1585_vm0, %v1584_v2 }
 0x207   :  { %1463 = vmatmul.mubr.msk.bf16.gmra.mxu0 %vm81_vm1, %v1505_v43 }
 0x267   :  { %v1757_v53 = vpop.f32.mrf.mxu0 }
 0x269   :  { %v1416_v54 = vpop.f32.mrf.mxu0 }
 0x26b   :  { %v1759_v55 = vpop.f32.mrf.mxu0 }
 0x26d   :  { %v1417_v56 = vpop.f32.mrf.mxu0 }
 0x26f   :  { %v1761_v57 = vpop.f32.mrf.mxu0 }
 0x271   :  { %v1420_v58 = vpop.f32.mrf.mxu0 }
 0x273   :  { %v1763_v59 = vpop.f32.mrf.mxu0 }
 0x275   :  { %v1421_v60 = vpop.f32.mrf.mxu0 }
 0x277   :  { %v1765_v61 = vpop.f32.mrf.mxu0 }
 0x278   :  { %v658_v39 = vmax.f32 %v1757_v53, %v1765_v61 }
 0x279   :  { %v1424_v62 = vpop.f32.mrf.mxu0 }
 0x27b   :  { %v1767_v63 = vpop.f32.mrf.mxu0 }
 0x27c   :  { %v659_v42 = vmax.f32 %v1759_v55, %v1767_v63 }
 0x27d   :  { %v1425_v0 = vpop.f32.mrf.mxu0 }
 0x27f   :  { %v1769_v1 = vpop.f32.mrf.mxu0 }
 0x280   :  { %v660_v43 = vmax.f32 %v1761_v57, %v1769_v1 }
 0x281   :  { %v1428_v3 = vpop.f32.mrf.mxu0 }
 0x283   :  { %v1771_v6 = vpop.f32.mrf.mxu0 }
 0x284   :  { %v661_v40 = vmax.f32 %v1763_v59, %v1771_v6 }
 0x285   :  { %v1429_v7 = vpop.f32.mrf.mxu0 }
 0x287   :  { %v1773_v8 = vpop.f32.mrf.mxu0 }
 0x288   :  { %v662_v44 = vmax.f32 %v658_v39, %v1773_v8  ;;  %v1834_v39 = vld [vmem:[#allocation3] sm:$0x1] }
 0x289   :  { %v1432_v9 = vpop.f32.mrf.mxu0 }
 0x28b   :  { %v1775_v10 = vpop.f32.mrf.mxu0 }
 0x28c   :  { %v663_v47 = vmax.f32 %v659_v42, %v1775_v10 }
 0x28d   :  { %v1433_v11 = vpop.f32.mrf.mxu0 }
 0x28f   :  { %v1778_v13 = vpop.f32.mrf.mxu0 }
 0x290   :  { %v664_v48 = vmax.f32 %v660_v43, %v1778_v13 }
 0x291   :  { %v1436_v14 = vpop.f32.mrf.mxu0 }
 0x293   :  { %v1780_v16 = vpop.f32.mrf.mxu0 }
 0x294   :  { %v665_v45 = vmax.f32 %v661_v40, %v1780_v16 }
 0x295   :  { %v1437_v17 = vpop.f32.mrf.mxu0 }
 0x297   :  { %v1782_v18 = vpop.f32.mrf.mxu0 }
 0x298   :  { %v666_v49 = vmax.f32 %v662_v44, %v1782_v18 }
 0x299   :  { %v1440_v19 = vpop.f32.mrf.mxu0 }
 0x29b   :  { %v1784_v20 = vpop.f32.mrf.mxu0 }
 0x29c   :  { %v667_v52 = vmax.f32 %v663_v47, %v1784_v20 }
 0x29d   :  { %v1441_v21 = vpop.f32.mrf.mxu0 }
 0x29f   :  { %v1786_v22 = vpop.f32.mrf.mxu0 }
 0x2a0   :  { %v668_v54 = vmax.f32 %v664_v48, %v1786_v22 }
 0x2a1   :  { %v1444_v23 = vpop.f32.mrf.mxu0 }
 0x2a3   :  { %v1788_v24 = vpop.f32.mrf.mxu0 }
 0x2a4   :  { %v669_v50 = vmax.f32 %v665_v45, %v1788_v24 }
 0x2a5   :  { %v1445_v25 = vpop.f32.mrf.mxu0 }
 0x2a7   :  { %v1790_v26 = vpop.f32.mrf.mxu0 }
 0x2a8   :  { %v670_v56 = vmax.f32 %v666_v49, %v1790_v26 }
 0x2a9   :  { %v1448_v27 = vpop.f32.mrf.mxu0 }
 0x2ab   :  { %v1792_v28 = vpop.f32.mrf.mxu0 }
 0x2ac   :  { %v671_v62 = vmax.f32 %v667_v52, %v1792_v28 }
 0x2ad   :  { %v1449_v29 = vpop.f32.mrf.mxu0 }
 0x2af   :  { %v1794_v30 = vpop.f32.mrf.mxu0 }
 0x2b0   :  { %v672_v0 = vmax.f32 %v668_v54, %v1794_v30 }
 0x2b1   :  { %v1452_v31 = vpop.f32.mrf.mxu0 }
 0x2b3   :  { %v1796_v32 = vpop.f32.mrf.mxu0 }
 0x2b4   :  { %v673_v58 = vmax.f32 %v669_v50, %v1796_v32 }
 0x2b5   :  { %v1453_v33 = vpop.f32.mrf.mxu0 }
 0x2b7   :  { %v1799_v35 = vpop.f32.mrf.mxu0 }
 0x2b8   :  { %v674_v3 = vmax.f32 %v670_v56, %v1799_v35 }
 0x2b9   :  { %v1456_v36 = vpop.f32.mrf.mxu0 }
 0x2bb   :  { %v1801_v37 = vpop.f32.mrf.mxu0 }
 0x2bc   :  { %v675_v11 = vmax.f32 %v671_v62, %v1801_v37 }
 0x2bd   :  { %v1457_v38 = vpop.f32.mrf.mxu0 }
 0x2bf   :  { %v1807_v41 = vpop.f32.mrf.mxu0 }
 0x2c0   :  { %v676_v14 = vmax.f32 %v672_v0, %v1807_v41 }
 0x2c1   :  { %v1460_v46 = vpop.f32.mrf.mxu0 }
 0x2c3   :  { %v1819_v51 = vpop.f32.mrf.mxu0 }
 0x2c4   :  { %v677_v7 = vmax.f32 %v673_v58, %v1819_v51 }
 0x2c5   :  { %v1461_v60 = vpop.f32.mrf.mxu0 }
 0x2c6   :  { %v680_v21 = vmax.f32 %v676_v14, %v677_v7 }
 0x2c7   :  { %v1829_v9 = vpop.f32.mrf.mxu0 }
 0x2c8   :  { %v678_v17 = vmax.f32 %v674_v3, %v1829_v9 }
 0x2c9   :  { %v1464_v19 = vpop.f32.mrf.mxu0 }
 0x2ca   :  { %v679_v23 = vmax.f32 %v678_v17, %v675_v11 }
 0x2cb   :  { %v501_v25 = vpop.f32.mrf.mxu0 }
 0x2cc   :  { %v681_v27 = vmax.f32 %v679_v23, %v680_v21 }
 0x2cd   :  { %v1465_v29 = vpop.f32.mrf.mxu0 }
 0x2ce   :  { %v682_v31 = vrot.slane %v681_v27, 4 }
 0x2d0   :  { %v683_v33 = vmax.f32 %v681_v27, %v682_v31 }
 0x2d2   :  { %v684_v34 = vrot.slane %v683_v33, 2 }
 0x2d4   :  { %v685_v36 = vmax.f32 %v683_v33, %v684_v34 }
 0x2d6   :  { %v686_v38 = vrot.slane %v685_v36, 1 }
 0x2d8   :  { %v687_v40 = vmax.f32 %v685_v36, %v686_v38 }
 0x2da   :  { %v1837_v42 = vmax.f32 %v1834_v39, %v687_v40 }
 0x2dc   :  { %v689_v43 = vsub.f32 %v1834_v39, %v1837_v42  ;;  %v1843_v44 = vrot.slane %v1837_v42, %v1675_v15  ;;  %947 = vst [vmem:[#allocation3] sm:$0x1] %v1837_v42 }
 0x2de   :  { %v698_v45 = vsub.f32 %v1757_v53, %v1843_v44  ;;  %v699_v46 = vsub.f32 %v1759_v55, %v1843_v44  ;;  %v700_v47 = vsub.f32 %v1761_v57, %v1843_v44  ;;  %v701_v48 = vsub.f32 %v1763_v59, %v1843_v44 }
 0x2df   :  { %v702_v49 = vsub.f32 %v1765_v61, %v1843_v44  ;;  %v703_v50 = vsub.f32 %v1767_v63, %v1843_v44  ;;  %v704_v52 = vsub.f32 %v1769_v1, %v1843_v44  ;;  %v705_v53 = vsub.f32 %v1771_v6, %v1843_v44 }
 0x2e0   :  { %v723_v54 = vmul.f32 1.442695, %v698_v45  ;;  %v725_v55 = vmul.f32 1.442695, %v699_v46  ;;  %v727_v56 = vmul.f32 1.442695, %v700_v47  ;;  %v706_v57 = vsub.f32 %v1773_v8, %v1843_v44 }
 0x2e1   :  { %v729_v58 = vmul.f32 1.442695, %v701_v48  ;;  %v731_v59 = vmul.f32 1.442695, %v702_v49  ;;  %v707_v61 = vsub.f32 %v1775_v10, %v1843_v44  ;;  %v733_v63 = vmul.f32 1.442695, %v703_v50 }
 0x2e2   :  { %1508 = vpow2.f32 %v723_v54  ;;  %v708_v1 = vsub.f32 %v1778_v13, %v1843_v44  ;;  %v735_v60 = vmul.f32 1.442695, %v704_v52  ;;  %v709_v6 = vsub.f32 %v1780_v16, %v1843_v44 }
 0x2e3   :  { %1510 = vpow2.f32 %v725_v55  ;;  %v737_v62 = vmul.f32 1.442695, %v705_v53  ;;  %v710_v8 = vsub.f32 %v1782_v18, %v1843_v44  ;;  %v739_v0 = vmul.f32 1.442695, %v706_v57 }
 0x2e4   :  { %1512 = vpow2.f32 %v727_v56  ;;  %v711_v10 = vsub.f32 %v1784_v20, %v1843_v44  ;;  %v741_v3 = vmul.f32 1.442695, %v707_v61  ;;  %v712_v13 = vsub.f32 %v1786_v22, %v1843_v44 }
 0x2e5   :  { %1514 = vpow2.f32 %v729_v58  ;;  %v743_v7 = vmul.f32 1.442695, %v708_v1  ;;  %v713_v16 = vsub.f32 %v1788_v24, %v1843_v44  ;;  %v745_v11 = vmul.f32 1.442695, %v709_v6 }
 0x2e6   :  { %1516 = vpow2.f32 %v731_v59  ;;  %v714_v18 = vsub.f32 %v1790_v26, %v1843_v44  ;;  %v747_v14 = vmul.f32 1.442695, %v710_v8  ;;  %v715_v20 = vsub.f32 %v1792_v28, %v1843_v44 }
 0x2e7   :  { %1518 = vpow2.f32 %v733_v63  ;;  %v749_v17 = vmul.f32 1.442695, %v711_v10  ;;  %v716_v22 = vsub.f32 %v1794_v30, %v1843_v44  ;;  %v751_v19 = vmul.f32 1.442695, %v712_v13 }
 0x2e8   :  { %1520 = vpow2.f32 %v735_v60  ;;  %v717_v24 = vsub.f32 %v1796_v32, %v1843_v44  ;;  %v753_v21 = vmul.f32 1.442695, %v713_v16  ;;  %v718_v26 = vsub.f32 %v1799_v35, %v1843_v44 }
 0x2e9   :  { %1522 = vpow2.f32 %v737_v62  ;;  %v755_v23 = vmul.f32 1.442695, %v714_v18  ;;  %v719_v28 = vsub.f32 %v1801_v37, %v1843_v44  ;;  %v757_v27 = vmul.f32 1.442695, %v715_v20 }
 0x2ea   :  { %1524 = vpow2.f32 %v739_v0  ;;  %v720_v29 = vsub.f32 %v1807_v41, %v1843_v44  ;;  %v759_v32 = vmul.f32 1.442695, %v716_v22  ;;  %v721_v35 = vsub.f32 %v1819_v51, %v1843_v44 }
 0x2eb   :  { %1526 = vpow2.f32 %v741_v3  ;;  %v761_v33 = vmul.f32 1.442695, %v717_v24  ;;  %v763_v36 = vmul.f32 1.442695, %v718_v26  ;;  %v765_v41 = vmul.f32 1.442695, %v719_v28 }
 0x2ec   :  { %1528 = vpow2.f32 %v743_v7  ;;  %v767_v46 = vmul.f32 1.442695, %v720_v29  ;;  %v769_v47 = vmul.f32 1.442695, %v721_v35  ;;  %v722_v20 = vsub.f32 %v1829_v9, %v1843_v44 }
 0x2ed   :  { %1530 = vpow2.f32 %v745_v11 }
 0x2ee   :  { %1532 = vpow2.f32 %v747_v14  ;;  %v771_v28 = vmul.f32 1.442695, %v722_v20 }
 0x2ef   :  { %v1888_v25 = vpop.eup %1508  ;;  %1534 = vpow2.f32 %v749_v17 }
 0x2f0   :  { %v1892_v30 = vpop.eup %1510  ;;  %1536 = vpow2.f32 %v751_v19 }
 0x2f1   :  { %v1896_v31 = vpop.eup %1512  ;;  %1538 = vpow2.f32 %v753_v21  ;;  %v775_v34 = vadd.f32 %v1892_v30, %v1888_v25 }
 0x2f2   :  { %v1902_v37 = vpop.eup %1514  ;;  %1540 = vpow2.f32 %v755_v23 }
 0x2f3   :  { %v1904_v38 = vpop.eup %1516  ;;  %1542 = vpow2.f32 %v757_v27  ;;  %v776_v40 = vadd.f32 %v1896_v31, %v775_v34 }
 0x2f4   :  { %v1907_v45 = vpop.eup %1518  ;;  %1544 = vpow2.f32 %v759_v32 }
 0x2f5   :  { %v1521_v51 = vpop.eup %1520  ;;  %1546 = vpow2.f32 %v761_v33  ;;  %v777_v48 = vadd.f32 %v1902_v37, %v776_v40  ;;  %v690_v40 = vmul.f32 1.442695, %v689_v43 }
 0x2f6   :  { %v1523_v49 = vpop.eup %1522  ;;  %1548 = vpow2.f32 %v763_v36  ;;  %v809_v36 = vpack.c.bf16 %v1907_v45, %v1904_v38 }
 0x2f7   :  { %v1525_v50 = vpop.eup %1524  ;;  %1550 = vpow2.f32 %v765_v41  ;;  %v778_v52 = vadd.f32 %v1904_v38, %v777_v48  ;;  %v810_v35 = vpack.c.bf16 %v1523_v49, %v1521_v51 }
 0x2f8   :  { %v1527_v54 = vpop.eup %1526  ;;  %1552 = vpow2.f32 %v767_v46 }
 0x2f9   :  { %v1529_v53 = vpop.eup %1528  ;;  %1554 = vpow2.f32 %v769_v47  ;;  %v779_v55 = vadd.f32 %v1907_v45, %v778_v52  ;;  %v811_v32 = vpack.c.bf16 %v1527_v54, %v1525_v50  ;;  %v807_v45 = vpack.c.bf16 %v1892_v30, %v1888_v25 }
 0x2fa   :  { %v1531_v56 = vpop.eup %1530  ;;  %1556 = vpow2.f32 %v771_v28 }
 0x2fb   :  { %v1533_v58 = vpop.eup %1532  ;;  %v780_v57 = vadd.f32 %v1521_v51, %v779_v55  ;;  %v812_v26 = vpack.c.bf16 %v1531_v56, %v1529_v53  ;;  %v808_v51 = vpack.c.bf16 %v1902_v37, %v1896_v31  ;;  %1558 = vpow2.f32 %v690_v40 }
 0x2fc   :  { %v1535_v59 = vpop.eup %1534  ;;  %v969_v31 = vmul.u32 8, %v1642_v4 }
 0x2fd   :  { %v1537_v61 = vpop.eup %1536  ;;  %v781_v63 = vadd.f32 %v1523_v49, %v780_v57  ;;  %v813_v11 = vpack.c.bf16 %v1535_v59, %v1533_v58 }
 0x2fe   :  { %v1539_v1 = vpop.eup %1538  ;;  %vm985_vm9 = vcmp.ge.s32.totalorder %v1644_v5, %v969_v31 }
 0x2ff   :  { %v1912_v60 = vpop.eup %1540  ;;  %v782_v6 = vadd.f32 %v1525_v50, %v781_v63  ;;  %v814_v62 = vpack.c.bf16 %v1539_v1, %v1537_v61 }
 0x300   :  { %v1914_v8 = vpop.eup %1542 }
 0x301   :  { %v1916_v0 = vpop.eup %1544  ;;  %v783_v10 = vadd.f32 %v1527_v54, %v782_v6  ;;  %877 = vmatpush1.bf16.msra.mxu1 %v814_v62  ;;  %v815_v3 = vpack.c.bf16 %v1914_v8, %v1912_v60  ;;  %v1001_v54 = vadd.s32 8, %v969_v31 }
 0x302   :  { %v1920_v13 = vpop.eup %1546  ;;  %878 = vmatprep.subr.bf16.mxu1 %v1588_v12 }
 0x303   :  { %v1923_v7 = vpop.eup %1548  ;;  %v784_v16 = vadd.f32 %v1529_v53, %v783_v10  ;;  %v816_v18 = vpack.c.bf16 %v1920_v13, %v1916_v0  ;;  %v773_v53 = vld [vmem:[#allocation4] sm:$0x1]  ;;  %vm1017_vm10 = vcmp.lt.s32.totalorder %v1644_v5, %v1001_v54  ;;  %v841_v5 = vpop.trf.xlu1 }
 0x304   :  { %v1551_v14 = vpop.eup %1550  ;;  %vm1033_vm11 = vmand %vm985_vm9, %vm1017_vm10 }
 0x305   :  { %v1553_v17 = vpop.eup %1552  ;;  %v785_v22 = vadd.f32 %v1531_v56, %v784_v16  ;;  %879 = vmatpush1.bf16.msra.mxu1 %v813_v11  ;;  %v817_v19 = vpack.c.bf16 %v1551_v14, %v1923_v7  ;;  %vm1065_vm13 = vmand %vm1033_vm11, %vm1049_vm12 }
 0x306   :  { %v1555_v24 = vpop.eup %1554  ;;  %880 = vmatprep.subr.bf16.mxu1 %v1588_v12 }
 0x307   :  { %v786_v21 = vadd.f32 %v1533_v58, %v785_v22  ;;  %v818_v23 = vpack.c.bf16 %v1555_v24, %v1553_v17  ;;  %v1557_v47 = vpop.eup %1556  ;;  %v842_v4 = vpop.trf.xlu1 }
 0x308   :  { %v819_v49 = vpack.c.bf16 %v1557_v47, %v1557_v47  ;;  %v1559_v30 = vpop.eup %1558 }
 0x309   :  { %v787_v27 = vadd.f32 %v1535_v59, %v786_v21  ;;  %881 = vmatpush1.bf16.msra.mxu1 %v812_v26  ;;  %v774_v56 = vmul.f32 %v1559_v30, %v773_v53  ;;  %v858_v59 = vpop.trf.xlu0  ;;  %v1507_v21 = vld [vmem:[%s1999_s4] sm:$0xff]  }
 0x30a   :  { %882 = vmatprep.subr.bf16.mxu1 %v1588_v12  ;;  %v874_v42 = vsel %vm872_vm8, %v819_v49, 0 }
 0x30b   :  { %v788_v29 = vadd.f32 %v1537_v61, %v787_v27  ;;  %v1589_v61 = vmov 1.0  }
 0x30d   :  { %v789_v9 = vadd.f32 %v1539_v1, %v788_v29  ;;  %883 = vmatpush1.bf16.msra.mxu1 %v811_v32  ;;  %v1363_v32 = vld [vmem:[%s1998_s3 + $0x8] sm:$0xff]  }
 0x30e   :  { %884 = vmatprep.subr.bf16.mxu1 %v1588_v12 }
 0x30f   :  { %v790_v44 = vadd.f32 %v1912_v60, %v789_v9 }
 0x311   :  { %v791_v33 = vadd.f32 %v1914_v8, %v790_v44  ;;  %885 = vmatpush1.bf16.msra.mxu1 %v810_v35  ;;  %v1360_v35 = vunpack.c.h.bf16 %v1363_v32 }
 0x312   :  { %886 = vmatprep.subr.bf16.mxu1 %v1588_v12 }
 0x313   :  { %v792_v34 = vadd.f32 %v1916_v0, %v791_v33  ;;  %v1359_v33 = vunpack.c.l.bf16 %v1363_v32 }
 0x315   :  { %v793_v41 = vadd.f32 %v1920_v13, %v792_v34  ;;  %887 = vmatpush1.bf16.msra.mxu1 %v809_v36 }
 0x316   :  { %888 = vmatprep.subr.bf16.mxu1 %v1588_v12 }
 0x317   :  { %v794_v46 = vadd.f32 %v1923_v7, %v793_v41 }
 0x319   :  { %v795_v48 = vadd.f32 %v1551_v14, %v794_v46  ;;  %889 = vmatpush1.bf16.msra.mxu1 %v808_v51 }
 0x31a   :  { %890 = vmatprep.subr.bf16.mxu1 %v1588_v12 }
 0x31b   :  { %v796_v38 = vadd.f32 %v1553_v17, %v795_v48 }
 0x31d   :  { %v797_v50 = vadd.f32 %v1555_v24, %v796_v38  ;;  %891 = vmatpush1.bf16.msra.mxu1 %v807_v45 }
 0x31e   :  { %898 = vmatprep.subr.bf16.mxu1 %v1588_v12 }
 0x31f   :  { %v798_v39 = vadd.f32 %v1557_v47, %v797_v50 }
 0x321   :  { %v799_v43 = vrot.slane %v798_v39, 4  ;;  %899 = vmatpush2.bf16.msra.mxu1 %v874_v42 }
 0x322   :  { %900 = vmatprep.subr.bf16.mxu1 %v1588_v12 }
 0x323   :  { %v800_v37 = vadd.f32 %v799_v43, %v798_v39 }
 0x325   :  { %v801_v52 = vrot.slane %v800_v37, 2  ;;  %901 = vmatpush2.bf16.msra.mxu1 %v818_v23  ;;  %v1354_v23 = vld [vmem:[%s1998_s3] sm:$0xff]  }
 0x326   :  { %902 = vmatprep.subr.bf16.mxu1 %v1588_v12  ;;  %v1355_v28 = vunpack.c.l.bf16 %v1354_v23  ;;  %v1356_v29 = vunpack.c.h.bf16 %v1354_v23 }
 0x327   :  { %v802_v25 = vadd.f32 %v801_v52, %v800_v37  ;;  %v1212_v52 = vld [vmem:[%s2000_s5] sm:$0x1] }
 0x329   :  { %v803_v55 = vrot.slane %v802_v25, 1  ;;  %903 = vmatpush2.bf16.msra.mxu1 %v817_v19 }
 0x32a   :  { %904 = vmatprep.subr.bf16.mxu1 %v1588_v12 }
 0x32b   :  { %v804_v58 = vadd.f32 %v803_v55, %v802_v25 }
 0x32d   :  { %v805_v57 = vadd.f32 %v804_v58, %v774_v56  ;;  %905 = vmatpush2.bf16.msra.mxu1 %v816_v18 }
 0x32e   :  { %906 = vmatprep.subr.bf16.mxu1 %v1588_v12  ;;  %v933_v12 = vrot.slane %v1559_v30, %v1675_v15 }
 0x32f   :  { %806 = vst [vmem:[#allocation4] sm:$0x1] %v805_v57 }
 0x330   :  { %v935_v6 = vmul.f32 0.0, %v933_v12 }
 0x331   :  { %907 = vmatpush2.bf16.msra.mxu1 %v815_v3 }
 0x332   :  { %1466 = vmatprep.subr.msk.mxu1 %vm1065_vm13, %v1589_v61 }
 0x334   :  { %909 = vmatmul.mubr.bf16.vlgmr.msra.gmra.mxu1 %v841_v5 }
 0x335   :  { %1326 = vmatprep.mubr.msk.bf16.mxu1 %vm865_vm3, %v858_v59  ;;  %1467 = vmatpush3.msk.msra.mxu1 %vm1065_vm13, %v1589_v61 }
 0x336   :  { %1474 = vmatprep.subr.bf16.mxu1 %v1584_v2  ;;  %v951_v63 = vld [vmem:[#allocation4] sm:$0x1] }
 0x337   :  { %1560 = vrcp.f32 %v951_v63 }
 0x33c   :  { %917 = vmatmul.mubr.bf16.gmra.mxu1 %v842_v4 }
 0x344   :  { %v1561_v1 = vpop.eup %1560 }
 0x345   :  { %v961_v8 = vrot.slane %v1561_v1, %v1675_v15  ;;  %v1506_v15 = vld [vmem:[%s1999_s4 + $0x8] sm:$0xff]  }
 0x3f4   :  { %v910_v60 = vpop.f32.mrf.mxu1 }
 0x3f5   :  { %v939_v62 = vadd.f32 %v935_v6, %v910_v60 }
 0x3f6   :  { %v912_v0 = vpop.f32.mrf.mxu1 }
 0x3f7   :  { %v963_v10 = vmul.f32 %v961_v8, %v939_v62 }
 0x3f8   :  { %v913_v3 = vpop.f32.mrf.mxu1 }
 0x3f9   :  { %v940_v13 = vadd.f32 %v935_v6, %v913_v3  ;;  %1468 = vmatprep.mubr.f32.mxu1 %v963_v10 }
 0x3fa   :  { %v915_v7 = vpop.f32.mrf.mxu1 }
 0x3fb   :  { %v964_v16 = vmul.f32 %v961_v8, %v940_v13 }
 0x3fc   :  { %v918_v11 = vpop.f32.mrf.mxu1 }
 0x3fd   :  { %v941_v18 = vadd.f32 %v935_v6, %v918_v11  ;;  %1469 = vmatmul.mubr.f32.vlgmr.msra.gmra.mxu1 %v964_v16 }
 0x3fe   :  { %v920_v14 = vpop.f32.mrf.mxu1  ;;  %1475 = vmatpush3.bf16.msra.mxu1 %v1506_v15 }
 0x3ff   :  { %v965_v20 = vmul.f32 %v961_v8, %v941_v18  ;;  %1476 = vmatprep.subr.bf16.mxu1 %v1584_v2 }
 0x400   :  { %v921_v17 = vpop.f32.mrf.mxu1 }
 0x401   :  { %v942_v22 = vadd.f32 %v935_v6, %v921_v17  ;;  %1471 = vmatprep.mubr.f32.mxu1 %v965_v20 }
 0x402   :  { %v923_v19 = vpop.f32.mrf.mxu1  ;;  %1477 = vmatpush3.bf16.msra.mxu1 %v1507_v21 }
 0x403   :  { %v966_v24 = vmul.f32 %v961_v8, %v942_v22 }
 0x405   :  { %1472 = vmatmul.mubr.f32.gmra.mxu1 %v966_v24 }
 0x406   :  { %1478 = vmatprep.mubr.msk.bf16.mxu1 %vm1585_vm0, %v1584_v2  ;;  %vm1268_vm0 = vcmask 253952  }
 0x4bd   :  { %v1470_v26 = vpop.f32.mrf.mxu1 }
 0x4be   :  { %v1191_v44 = vmul.f32 %v1470_v26, %v1356_v29 }
 0x4bf   :  { %v1163_v27 = vpop.f32.mrf.mxu1 }
 0x4c0   :  { %v1190_v9 = vmul.f32 %v1355_v28, %v1163_v27  ;;  %v1195_v41 = vsel %vm81_vm1, %v1191_v44, 0.0 }
 0x4c2   :  { %v1194_v2 = vsel %vm81_vm1, %v1190_v9, 0.0 }
 0x4c3   :  { %v1196_v51 = vadd.f32 %v1195_v41, %v1194_v2 }
 0x4c5   :  { %v1473_v34 = vpop.f32.mrf.mxu1 }
 0x4c6   :  { %v1193_v40 = vmul.f32 %v1473_v34, %v1360_v35 }
 0x4c7   :  { %v1173_v36 = vpop.f32.mrf.mxu1 }
 0x4c8   :  { %v1192_v46 = vmul.f32 %v1359_v33, %v1173_v36  ;;  %v1199_v38 = vsel %vm81_vm1, %v1193_v40, 0.0 }
 0x4ca   :  { %v1197_v47 = vsel %vm81_vm1, %v1192_v46, 0.0 }
 0x4cb   :  { %v1198_v48 = vadd.f32 %v1197_v47, %v1196_v51 }
 0x4cd   :  { %v1200_v45 = vadd.f32 %v1199_v38, %v1198_v48 }
 0x4cf   :  { %v1201_v49 = vrot.slane %v1200_v45, 4 }
 0x4d1   :  { %v1202_v50 = vadd.f32 %v1201_v49, %v1200_v45 }
 0x4d3   :  { %v1203_v39 = vrot.slane %v1202_v50, 2 }
 0x4d5   :  { %v1204_v42 = vadd.f32 %v1203_v39, %v1202_v50 }
 0x4d7   :  { %v1205_v43 = vrot.slane %v1204_v42, 1 }
 0x4d9   :  { %v1206_v31 = vadd.f32 %v1205_v43, %v1204_v42 }
 0x4db   :  { %v1207_v37 = vpack.c.bf16 %v1206_v31, %v1206_v31 }
 0x4dd   :  { %1479 = vmatmul.mubr.msk.bf16.vlgmr.msra.gmra.mxu1 %vm81_vm1, %v1207_v37 }
 0x59d   :  { %v1262_v54 = vpop.f32.mrf.mxu1 }
 0x59e   :  { %v1263_v25 = vadd.f32 %v1262_v54, %v1212_v52 }
 0x59f   :  { %v1480_v30 = vpop.f32.mrf.mxu1 }
 0x5a0   :  { %1269 = vst.msk [vmem:[#allocation6] sm:$0x1] %vm1268_vm0, %v1263_v25 }
 0x5a1   :  { %v1265_v53 = vpop.f32.mrf.mxu1 }
 0x5a2   :  { %1573 = shalt.err (!%p1570_p4)
}
 0x5a3   :  { %1279 = dma.vmem_to_hbm [thread:$0]  %s1277_s16, 16, %s2002_s7, [#allocation7]   ;;  %v1481_v55 = vpop.f32.mrf.mxu1 }
 0x5a4   :  { %1582 = dma.done.wait [#allocation7], 16  }
 0x5a5   :  { %1583 = vsyncadd [#allocation7], 4294967280 }
 0x5a6   :  { %1283 = vsyncpa [#allocation7], 1 }

</bundles_post_ra>
